<compile_context>
chip_gen: v7x
topology: tpu7x:2x2x1
jax: 0.10.0
libtpu: 0.0.40
codegen_flags: <defaults>
</compile_context>

<pallas_src>
import jax
import jax.numpy as jnp
from jax.experimental import pallas as pl
from jax.experimental.pallas import tpu as pltpu


def _round_up(x, m):
    return (x + m - 1) // m * m


def _augode_kernel(y_ref, e_ref, w1_ref, bias_ref, w2_ref, b2_ref,
                   dy_ref, negdiv_ref):
    tb = y_ref.shape[0]

    y = y_ref[...]            # (TB, Dp)  bf16
    e = e_ref[...]            # (TB, Dp)  bf16 (zero outside effective dims / pad)
    w1 = w1_ref[...]          # (Dp, Hp)  bf16
    w2 = w2_ref[...]          # (Hp, Dp)  bf16
    bias = bias_ref[...]      # (1, Hp)   f32  == b1 + t*c1 (folded in wrapper)
    b2 = b2_ref[...]          # (1, Dp)   f32

    # Fused first matmul: [y; e] @ W1  (one MXU pass for both operands).
    ye = jnp.concatenate([y, e], axis=0)                               # (2TB, Dp) bf16
    hu = jnp.dot(ye, w1, preferred_element_type=jnp.float32)           # (2TB, Hp) f32
    h = hu[:tb] + bias                                                 # (TB, Hp) f32
    u = hu[tb:]                                                        # (TB, Hp) f32

    a = jnp.tanh(h)                                                    # f32 (EUP)
    g = (1.0 - a * a) * u                                              # f32 (VPU)

    # Fused second matmul: [a; g] @ W2.
    ag = jnp.concatenate([a, g], axis=0).astype(w2.dtype)              # (2TB, Hp) bf16
    out2 = jnp.dot(ag, w2, preferred_element_type=jnp.float32)         # (2TB, Dp) f32
    dy = out2[:tb] + b2                                                # diffeq output
    je = out2[tb:]                                                     # analytic J e

    dy_ref[...] = dy.astype(dy_ref.dtype)

    # Hutchinson divergence:  div = sum_d e_d * (J e)_d   (f32, cross-lane XLU).
    div = jnp.sum(e.astype(jnp.float32) * je, axis=1, keepdims=True)   # (TB, 1)
    # Lane-dense (128-wide) store; wrapper slices column 0.  forward() returns -div.
    negdiv_ref[...] = jnp.broadcast_to(-div, negdiv_ref.shape).astype(negdiv_ref.dtype)


def aug_odefunc_forward(t, states, params, e, *, block_batch=512):
    """Mirror of AugODEfunc.forward(t, states) (approximate divergence, no residual).

    Returns (dy, -divergence, zeros for states[2:]).
    """
    y = states[0]
    B, D = y.shape
    w1, b1, c1, w2, b2 = params
    H = w1.shape[1]

    f32, bf16 = jnp.float32, jnp.bfloat16

    # Lane-dense padded dims.
    Dp = _round_up(D, 128)
    Hp = _round_up(H, 128)

    # Batch tile: multiple of 16 (bf16 sublane packing), capped so the
    # double-buffered streaming tiles + live intermediates fit a v7x-safe budget.
    per_row_bytes = 2 * (Dp * (2 + 2 + 4) + 128 * 4) + 12 * max(Dp, Hp)
    tb_cap = max(16, (int((24 * 1024 * 1024) // per_row_bytes) // 16) * 16)
    TB = min(int(block_batch), tb_cap, _round_up(B, 16))
    TB = max(16, (TB // 16) * 16)
    Bp = _round_up(B, TB)

    # Hoist time conditioning out of the grid loop: one (1, H) op per ODE step.
    bias = b1 + jnp.asarray(t, f32) * c1

    # Pad everything to lane/sublane-aligned shapes; matmul operands in bf16.
    yp = jnp.zeros((Bp, Dp), f32).at[:B, :D].set(y).astype(bf16)
    ep = jnp.zeros((Bp, Dp), f32).at[:B, :D].set(e).astype(bf16)
    w1p = jnp.zeros((Dp, Hp), f32).at[:D, :H].set(w1).astype(bf16)
    w2p = jnp.zeros((Hp, Dp), f32).at[:H, :D].set(w2).astype(bf16)
    biasp = jnp.zeros((1, Hp), f32).at[:, :H].set(bias)
    b2p = jnp.zeros((1, Dp), f32).at[:, :D].set(b2)

    # Explicit VMEM limit (v7x physical is 64 MiB).
    weight_bytes = (Dp * Hp + Hp * Dp) * 2 + (Hp + Dp) * 4
    stream_bytes = TB * Dp * (2 + 2 + 4) + TB * 128 * 4
    est = 2 * weight_bytes + 2 * stream_bytes + 16 * TB * max(Dp, Hp)
    vmem_limit = int(min(64 * 1024 * 1024, max(32 * 1024 * 1024, 2 * est)))

    grid = (Bp // TB,)
    dy_p, negdiv_p = pl.pallas_call(
        _augode_kernel,
        out_shape=(
            jax.ShapeDtypeStruct((Bp, Dp), f32),
            jax.ShapeDtypeStruct((Bp, 128), f32),
        ),
        grid_spec=pltpu.PrefetchScalarGridSpec(
            num_scalar_prefetch=0,
            grid=grid,
            in_specs=[
                pl.BlockSpec((TB, Dp), lambda i: (i, 0)),   # y   (streamed)
                pl.BlockSpec((TB, Dp), lambda i: (i, 0)),   # e   (streamed)
                pl.BlockSpec((Dp, Hp), lambda i: (0, 0)),   # W1  (resident)
                pl.BlockSpec((1, Hp), lambda i: (0, 0)),    # b1 + t*c1
                pl.BlockSpec((Hp, Dp), lambda i: (0, 0)),   # W2  (resident)
                pl.BlockSpec((1, Dp), lambda i: (0, 0)),    # b2
            ],
            out_specs=(
                pl.BlockSpec((TB, Dp), lambda i: (i, 0)),   # dy
                pl.BlockSpec((TB, 128), lambda i: (i, 0)),  # -div (lane-dense slab)
            ),
        ),
        compiler_params=pltpu.CompilerParams(
            dimension_semantics=("parallel",),
            vmem_limit_bytes=vmem_limit,
        ),
    )(yp, ep, w1p, biasp, w2p, b2p)

    dy = dy_p[:B, :D]
    negdiv = negdiv_p[:B, :1]

    # states[2:] map to zeros (requires_grad_ is a torch-autograd detail; no-op here)
    extras = tuple(jnp.zeros_like(s) for s in states[2:])
    return (dy, negdiv) + extras


def make_hutchinson_noise(key, y, effective_shape):
    """before_odeint()-style noise: gaussian on first `effective_shape` features, zero after."""
    B, D = y.shape
    sample = jax.random.normal(key, (B, effective_shape), dtype=y.dtype)
    e = jnp.zeros_like(y)
    e = e.at[:, :effective_shape].set(sample)
    return e


def _diffeq_ref(t, y, params):
    w1, b1, c1, w2, b2 = params
    h = y @ w1 + b1 + t * c1
    return jnp.tanh(h) @ w2 + b2


def _kernel_ref(t, y, e, params):
    """Pure-JAX reference with the same dtype handling as the kernel
    (bf16 matmul operands, f32 accumulation / elementwise)."""
    w1, b1, c1, w2, b2 = params
    f32, bf16 = jnp.float32, jnp.bfloat16
    yb, eb = y.astype(bf16), e.astype(bf16)
    w1b, w2b = w1.astype(bf16), w2.astype(bf16)
    bias = b1 + t * c1
    h = jnp.dot(yb, w1b, preferred_element_type=f32) + bias
    u = jnp.dot(eb, w1b, preferred_element_type=f32)
    a = jnp.tanh(h)
    dy = jnp.dot(a.astype(bf16), w2b, preferred_element_type=f32) + b2
    g = ((1.0 - a * a) * u).astype(bf16)
    je = jnp.dot(g, w2b, preferred_element_type=f32)
    div = jnp.sum(eb.astype(f32) * je, axis=1, keepdims=True)
    return dy, -div


def _rel_err(a, b):
    return float(jnp.linalg.norm((a - b).ravel()) / (jnp.linalg.norm(b.ravel()) + 1e-12))


if __name__ == "__main__":
    B, D, H = 40, 48, 96
    effective_shape = 24

    key = jax.random.PRNGKey(0)
    k_y, k_e, k_w1, k_c1, k_w2, k_aux = jax.random.split(key, 6)

    # states: (y, logp, extra_state)
    y = jax.random.normal(k_y, (B, D), dtype=jnp.float32)
    logp = jnp.zeros((B, 1), dtype=jnp.float32)
    extra = jax.random.normal(k_aux, (B, 4), dtype=jnp.float32)
    states = (y, logp, extra)

    # deterministic synthetic diffeq parameters (MLP: D -> H -> D)
    w1 = 0.3 * jax.random.normal(k_w1, (D, H), dtype=jnp.float32)
    b1 = jnp.zeros((1, H), dtype=jnp.float32)
    c1 = 0.1 * jax.random.normal(k_c1, (1, H), dtype=jnp.float32)   # time conditioning
    w2 = 0.3 * jax.random.normal(k_w2, (H, D), dtype=jnp.float32)
    b2 = jnp.zeros((1, D), dtype=jnp.float32)
    params = (w1, b1, c1, w2, b2)

    t = 0.5
    e = make_hutchinson_noise(k_e, y, effective_shape)

    # block_batch=16 so the demo exercises a multi-step batch grid (Bp=48 -> 3 tiles).
    outs = aug_odefunc_forward(t, states, params, e, block_batch=16)
    outs = jax.block_until_ready(outs)
    dy_k, negdiv_k, extra_zero = outs

    # 1) Loose check vs. exact-f32 autograd (VJP) Hutchinson reference — the kernel
    #    feeds the MXU bf16 operands, so only norm-relative agreement is expected.
    dy_f32, vjp_fn = jax.vjp(lambda yy: _diffeq_ref(jnp.float32(t), yy, params), y)
    e_dzdx = vjp_fn(e)[0]
    div_f32 = jnp.sum((e_dzdx * e).reshape(B, -1), axis=1, keepdims=True)
    assert _rel_err(dy_k, dy_f32) < 5e-2
    assert _rel_err(negdiv_k, -div_f32) < 1e-1

    # 2) Tight check vs. a dtype-matched reference (verifies fusion/tiling/JVP math).
    dy_bf, negdiv_bf = _kernel_ref(jnp.float32(t), y, e, params)
    assert jnp.allclose(dy_k, dy_bf, atol=2e-3, rtol=2e-3)
    assert jnp.allclose(negdiv_k, negdiv_bf, atol=2e-3, rtol=2e-3)

    assert extra_zero.shape == extra.shape and jnp.all(extra_zero == 0)

    print("KERNEL_OK")
</pallas_src>

<mosaic_0001>
module attributes {stable_mosaic.version = 11 : i64} {
  func.func @_augode_kernel(%arg0: i32, %arg1: memref<16x128xbf16, #tpu.memory_space<vmem>>, %arg2: memref<16x128xbf16, #tpu.memory_space<vmem>>, %arg3: memref<128x128xbf16, #tpu.memory_space<vmem>>, %arg4: memref<1x128xf32, #tpu.memory_space<vmem>>, %arg5: memref<128x128xbf16, #tpu.memory_space<vmem>>, %arg6: memref<1x128xf32, #tpu.memory_space<vmem>>, %arg7: memref<16x128xf32, #tpu.memory_space<vmem>>, %arg8: memref<16x128xf32, #tpu.memory_space<vmem>>) attributes {dimension_semantics = [#tpu.dimension_semantics<parallel>], iteration_bounds = array<i64: 3>, scalar_prefetch = 0 : i64, scratch_operands = 0 : i64, tpu.core_type = #tpu.core_type<tc>, window_params = [{transform_indices = @transform_0, window_bounds = array<i64: 16, 128>}, {transform_indices = @transform_1, window_bounds = array<i64: 16, 128>}, {pipeline_mode = #tpu.pipeline_mode<synchronous>, transform_indices = @transform_2, window_bounds = array<i64: 128, 128>}, {pipeline_mode = #tpu.pipeline_mode<synchronous>, transform_indices = @transform_3, window_bounds = array<i64: 1, 128>}, {pipeline_mode = #tpu.pipeline_mode<synchronous>, transform_indices = @transform_4, window_bounds = array<i64: 128, 128>}, {pipeline_mode = #tpu.pipeline_mode<synchronous>, transform_indices = @transform_5, window_bounds = array<i64: 1, 128>}, {transform_indices = @transform_6, window_bounds = array<i64: 16, 128>}, {transform_indices = @transform_7, window_bounds = array<i64: 16, 128>}]} {
    %c0 = arith.constant 0 : index
    %c0_0 = arith.constant 0 : index
    %0 = vector.load %arg1[%c0, %c0_0] : memref<16x128xbf16, #tpu.memory_space<vmem>>, vector<16x128xbf16>
    %c0_1 = arith.constant 0 : index
    %c0_2 = arith.constant 0 : index
    %1 = vector.load %arg2[%c0_1, %c0_2] : memref<16x128xbf16, #tpu.memory_space<vmem>>, vector<16x128xbf16>
    %c0_3 = arith.constant 0 : index
    %c0_4 = arith.constant 0 : index
    %2 = vector.load %arg3[%c0_3, %c0_4] : memref<128x128xbf16, #tpu.memory_space<vmem>>, vector<128x128xbf16>
    %c0_5 = arith.constant 0 : index
    %c0_6 = arith.constant 0 : index
    %3 = vector.load %arg5[%c0_5, %c0_6] : memref<128x128xbf16, #tpu.memory_space<vmem>>, vector<128x128xbf16>
    %c0_7 = arith.constant 0 : index
    %c0_8 = arith.constant 0 : index
    %4 = vector.load %arg4[%c0_7, %c0_8] : memref<1x128xf32, #tpu.memory_space<vmem>>, vector<1x128xf32>
    %c0_9 = arith.constant 0 : index
    %c0_10 = arith.constant 0 : index
    %5 = vector.load %arg6[%c0_9, %c0_10] : memref<1x128xf32, #tpu.memory_space<vmem>>, vector<1x128xf32>
    %6 = tpu.concatenate %0, %1 in 0 : vector<16x128xbf16>, vector<16x128xbf16> -> vector<32x128xbf16>
    %cst = arith.constant dense<0.000000e+00> : vector<32x128xf32>
    %7 = tpu.matmul %6, %2, %cst {dimension_numbers = #tpu.dot_dimension_numbers<[1], [0], [0], [1], [0, 0, 1, 1], [], []>} : vector<32x128xbf16>, vector<128x128xbf16>, vector<32x128xf32> -> vector<32x128xf32>
    %8 = vector.extract_strided_slice %7 {offsets = [0, 0], sizes = [16, 128], strides = [1, 1]} : vector<32x128xf32> to vector<16x128xf32>
    %9 = vector.broadcast %4 : vector<1x128xf32> to vector<16x128xf32>
    %10 = arith.addf %8, %9 : vector<16x128xf32>
    %11 = vector.extract_strided_slice %7 {offsets = [16, 0], sizes = [16, 128], strides = [1, 1]} : vector<32x128xf32> to vector<16x128xf32>
    %12 = math.tanh %10 : vector<16x128xf32>
    %13 = arith.mulf %12, %12 : vector<16x128xf32>
    %cst_11 = arith.constant 1.000000e+00 : f32
    %14 = vector.broadcast %cst_11 : f32 to vector<16x128xf32>
    %15 = arith.subf %14, %13 : vector<16x128xf32>
    %16 = arith.mulf %15, %11 : vector<16x128xf32>
    %17 = tpu.concatenate %12, %16 in 0 : vector<16x128xf32>, vector<16x128xf32> -> vector<32x128xf32>
    %18 = arith.truncf %17 : vector<32x128xf32> to vector<32x128xbf16>
    %cst_12 = arith.constant dense<0.000000e+00> : vector<32x128xf32>
    %19 = tpu.matmul %18, %3, %cst_12 {dimension_numbers = #tpu.dot_dimension_numbers<[1], [0], [0], [1], [0, 0, 1, 1], [], []>} : vector<32x128xbf16>, vector<128x128xbf16>, vector<32x128xf32> -> vector<32x128xf32>
    %20 = vector.extract_strided_slice %19 {offsets = [0, 0], sizes = [16, 128], strides = [1, 1]} : vector<32x128xf32> to vector<16x128xf32>
    %21 = vector.broadcast %5 : vector<1x128xf32> to vector<16x128xf32>
    %22 = arith.addf %20, %21 : vector<16x128xf32>
    %23 = vector.extract_strided_slice %19 {offsets = [16, 0], sizes = [16, 128], strides = [1, 1]} : vector<32x128xf32> to vector<16x128xf32>
    %c0_13 = arith.constant 0 : index
    %c0_14 = arith.constant 0 : index
    %24 = vector.load %arg7[%c0_13, %c0_14] : memref<16x128xf32, #tpu.memory_space<vmem>>, vector<16x128xf32>
    tpu.vector_store %arg7[%c0_13, %c0_14], %22 {strides = array<i32>} : memref<16x128xf32, #tpu.memory_space<vmem>>, vector<16x128xf32>,
    %25 = arith.extf %1 : vector<16x128xbf16> to vector<16x128xf32>
    %26 = arith.mulf %25, %23 : vector<16x128xf32>
    %cst_15 = arith.constant dense<0.000000e+00> : vector<16xf32>
    %27 = vector.multi_reduction <add>, %26, %cst_15 [1] : vector<16x128xf32> to vector<16xf32>
    %28 = vector.shape_cast %27 : vector<16xf32> to vector<16x1xf32>
    %cst_16 = arith.constant 0.000000e+00 : f32
    %29 = vector.broadcast %cst_16 : f32 to vector<16x1xf32>
    %30 = arith.subf %29, %28 : vector<16x1xf32>
    %31 = vector.shape_cast %30 : vector<16x1xf32> to vector<16x1xf32>
    %32 = vector.broadcast %31 : vector<16x1xf32> to vector<16x128xf32>
    %c0_17 = arith.constant 0 : index
    %c0_18 = arith.constant 0 : index
    %33 = vector.load %arg8[%c0_17, %c0_18] : memref<16x128xf32, #tpu.memory_space<vmem>>, vector<16x128xf32>
    tpu.vector_store %arg8[%c0_17, %c0_18], %32 {strides = array<i32>} : memref<16x128xf32, #tpu.memory_space<vmem>>, vector<16x128xf32>,
    return
  }
  func.func @transform_0(%arg0: i32) -> (i32, i32) {
    %c0_i32 = arith.constant 0 : i32
    %c0_i32_0 = arith.constant 0 : i32
    return %arg0, %c0_i32 : i32, i32
  }
  func.func @transform_1(%arg0: i32) -> (i32, i32) {
    %c0_i32 = arith.constant 0 : i32
    %c0_i32_0 = arith.constant 0 : i32
    return %arg0, %c0_i32 : i32, i32
  }
  func.func @transform_2(%arg0: i32) -> (i32, i32) {
    %c0_i32 = arith.constant 0 : i32
    %c0_i32_0 = arith.constant 0 : i32
    %c0_i32_1 = arith.constant 0 : i32
    return %c0_i32, %c0_i32_0 : i32, i32
  }
  func.func @transform_3(%arg0: i32) -> (i32, i32) {
    %c0_i32 = arith.constant 0 : i32
    %c0_i32_0 = arith.constant 0 : i32
    %c0_i32_1 = arith.constant 0 : i32
    return %c0_i32, %c0_i32_0 : i32, i32
  }
  func.func @transform_4(%arg0: i32) -> (i32, i32) {
    %c0_i32 = arith.constant 0 : i32
    %c0_i32_0 = arith.constant 0 : i32
    %c0_i32_1 = arith.constant 0 : i32
    return %c0_i32, %c0_i32_0 : i32, i32
  }
  func.func @transform_5(%arg0: i32) -> (i32, i32) {
    %c0_i32 = arith.constant 0 : i32
    %c0_i32_0 = arith.constant 0 : i32
    %c0_i32_1 = arith.constant 0 : i32
    return %c0_i32, %c0_i32_0 : i32, i32
  }
  func.func @transform_6(%arg0: i32) -> (i32, i32) {
    %c0_i32 = arith.constant 0 : i32
    %c0_i32_0 = arith.constant 0 : i32
    return %arg0, %c0_i32 : i32, i32
  }
  func.func @transform_7(%arg0: i32) -> (i32, i32) {
    %c0_i32 = arith.constant 0 : i32
    %c0_i32_0 = arith.constant 0 : i32
    return %arg0, %c0_i32 : i32, i32
  }
}

</mosaic_0001>

<bundles_post_ra>
// kernel: tpu_custom_call.1
= control target key start
LH: loop header
LB: loop body
LE: loop exit
PB: predicated region body
PF: predicated region fallthrough
CT: control target
= control target key end

     0   :  { %s1678_s0 = inlined_call_operand.hbm [shape: bf16[48,128], index: 0, kind: input, shape index: {}]   ;;  %s1679_s1 = inlined_call_operand.hbm [shape: bf16[48,128], index: 1, kind: input, shape index: {}]   ;;  %s1680_s2 = inlined_call_operand.hbm [shape: bf16[128,128], index: 2, kind: input, shape index: {}]   ;;  %s1681_s3 = inlined_call_operand.vmem [shape: f32[1,128], index: 3, kind: input, shape index: {}]   ;;  %s1682_s4 = inlined_call_operand.hbm [shape: bf16[128,128], index: 4, kind: input, shape index: {}]   ;;  %s1683_s5 = inlined_call_operand.vmem [shape: f32[1,128], index: 5, kind: input, shape index: {}]   ;;  %s1684_s6 = inlined_call_operand.hbm [shape: f32[48,128], index: 6, kind: output, shape index: {0}]   ;;  %s1685_s7 = inlined_call_operand.hbm [shape: f32[48,128], index: 7, kind: output, shape index: {1}]  }
   0x1   :  { %1693 = sst [smem:[#allocation20_spill]] %s1678_s0 }
   0x2   :  { %1694 = sst [smem:[#allocation21_spill]] %s1680_s2 }
   0x3   :  { %1695 = sst [smem:[#allocation22_spill]] %s1682_s4 }
   0x4   :  { %13 = vsyncpa [#allocation3], 0 }
   0x5   :  { %15 = vsyncpa [#allocation3 + $0x1], 0 }
   0x6   :  { %16 = vsyncpa [#allocation6], 0 }
   0x7   :  { %18 = vsyncpa [#allocation6 + $0x1], 0 }
   0x8   :  { %19 = vsyncpa [#allocation9], 0 }
   0x9   :  { %20 = vsyncpa [#allocation4], 0 }
   0xa   :  { %22 = vsyncpa [#allocation4 + $0x1], 0 }
   0xb   :  { %23 = vsyncpa [#allocation12], 0 }
   0xc   :  { %25 = vsyncpa [#allocation12 + $0x1], 0  ;;  %s1340_s24 = smov 0   ;;  %s1342_s25 = smov 0  }
   0xd   :  { %s1344_s26 = smov 0   ;;  %s1346_s27 = smov 0  }
   0xe LB: > { %s1361_s28 = sadd.s32 4294967295, %s1288_s27   ;;  %s848_s29 = sadd.s32 4294967294, %s1288_s27   ;;  %s1288_s27 = sphi %s1346_s27, %s1720_s27   ;;  %s1284_s26 = sphi %s1344_s26, %s1719_s26   ;;  %s1280_s25 = sphi %s1342_s25, %s1718_s25   ;;  %s1276_s24 = sphi %s1340_s24, %s1717_s24  }
   0xf   : > { %p51_p0 = scmp.ne.s32.totalorder %s1280_s25, %s1276_s24  ;;  %p1686_p1 = scmp.eq.s32.totalorder %s1361_s28, 0 }
  0x10   : > { %p191_p3 = scmp.eq.s32.totalorder %s848_s29, 2  ;;  %p849_p5 = scmp.ge.s32.totalorder %s1288_s27, 1 }
  0x11   : > { %p1370_p4 = por %p1686_p1, %p51_p0  ;;  %p224_p7 = scmp.lt.s32.totalorder %s1288_s27, 4 }
  0x12   : > { %p1375_p6 = por %p191_p3, %p51_p0  ;;  %s1290_s10 = smov [#allocation7]  }
  0x13   : > { %s1696_s30 = scalar_select %p1370_p4, 1, 0 }
  0x14   : > { %s1697_s8 = scalar_select %p1375_p6, 1, 0 }
  0x15   : > { %p1380_p8 = pnand %p849_p5, %p224_p7  ;;  %s236_s11 = sshll.u32 %s1290_s10, 4  ;;  %s237_s11 = int_to_ptr.vmem [resolvable:$true] %s236_s11 }
  0x16   : > { %s1291_s13 = smov [#allocation8]   ;;  %s1700_s2 = sld [smem:[#allocation21_spill]] }
  0x17   : > { %s1698_s9 = scalar_select %p1380_p8, 1, 0 }
  0x18   : > { %p974_p9 = pneg %p1380_p8  ;;  %s252_s14 = sshll.u32 %s1291_s13, 4  ;;  %s1392_s14 = int_to_ptr.vmem [resolvable:$true] %s252_s14 }
  0x1a   : > { %p1388_p10 = pnand %p974_p9, %p1686_p1 }
  0x1c   : > { %s1062_s17 = scalar_lea.hbm %s1700_s2, 1024  ;;  %p1064_p12 = pneg %p1388_p10 }
  0x1d   : > { %p1063_p11 = scmp.ne.s32.totalorder %s1700_s2, %s1062_s17  ;;  %p1069_p3 = scmp.lt.u32.totalorder %s1062_s17, %s1700_s2 }
  0x1f   : > { %p1065_p13 = pnand %p1064_p12, %p1063_p11 }
  0x21   : > { %p1066_p0 = pneg %p1065_p13 }
  0x23   : > { %p1071_p5 = pnand %p1069_p3, %p1066_p0 }
  0x25   : > { %1074 = shalt.err (!%p1071_p5)
}
  0x26   : > { %s1075_s22 = scalar_lea.vmem %s237_s11, 1024  ;;  %p1083_p2 = scmp.lt.s32.totalorder %s237_s11, %s237_s11 }
  0x27   : > { %p1076_p7 = scmp.ne.s32.totalorder %s237_s11, %s1075_s22  ;;  %p1084_p6 = scmp.lt.s32.totalorder %s1075_s22, %s1075_s22 }
  0x29   : > { %p1078_p9 = pnand %p1076_p7, %p1064_p12  ;;  %p1085_p4 = por %p1084_p6, %p1083_p2 }
  0x2b   : > { %p1079_p1 = pneg %p1078_p9 }
  0x2d   : > { %p1086_p8 = pnand %p1085_p4, %p1079_p1 }
  0x2f   : > { %1089 = shalt.err (!%p1086_p8)
}
  0x30   : > { %s1689_s23 = smov 64   ;;  %s1691_s29 = smov 4  }
  0x31   : > { %977 = dma.hbm_to_vmem [thread:$0]  (!%p1388_p10), %s1700_s2, 1024, %s237_s11, [#allocation6], %s1689_s23, %s1689_s23, %s1691_s29  }
  0x32   : > { %s1701_s4 = sld [smem:[#allocation22_spill]] }
  0x38   : > { %s1090_s17 = scalar_lea.hbm %s1701_s4, 1024 }
  0x39   : > { %p1091_p1 = scmp.ne.s32.totalorder %s1701_s4, %s1090_s17  ;;  %p1097_p6 = scmp.lt.u32.totalorder %s1090_s17, %s1701_s4 }
  0x3b   : > { %p1093_p2 = pnand %p1091_p1, %p1064_p12 }
  0x3d   : > { %p1094_p4 = pneg %p1093_p2 }
  0x3f   : > { %p1099_p8 = pnand %p1097_p6, %p1094_p4 }
  0x41   : > { %1102 = shalt.err (!%p1099_p8)
}
  0x42   : > { %s1103_s11 = scalar_lea.vmem %s1392_s14, 1024  ;;  %p1111_p3 = scmp.lt.s32.totalorder %s1392_s14, %s1392_s14 }
  0x43   : > { %p1104_p11 = scmp.ne.s32.totalorder %s1392_s14, %s1103_s11  ;;  %p1112_p5 = scmp.lt.s32.totalorder %s1103_s11, %s1103_s11 }
  0x45   : > { %p1106_p13 = pnand %p1104_p11, %p1064_p12  ;;  %p1113_p7 = por %p1112_p5, %p1111_p3 }
  0x47   : > { %p1107_p0 = pneg %p1106_p13 }
  0x49   : > { %p1114_p9 = pnand %p1113_p7, %p1107_p0 }
  0x4b   : > { %1117 = shalt.err (!%p1114_p9)
}
  0x4c   : > { %980 = dma.hbm_to_vmem [thread:$0]  (!%p1388_p10), %s1701_s4, 1024, %s1392_s14, [#allocation9], %s1689_s23, %s1689_s23, %s1691_s29  }
  0x4d   : > { %s1448_s12 = sadd.s32 1, %s1288_s27   ;;  %s38_s13 = sadd.s32 1, %s1284_s26 }
  0x4e   : > { %s35_s15 = ssub.s32 %s1288_s27, %s1448_s12  ;;  %p45_p12 = scmp.ne.s32.totalorder %s1284_s26, %s1280_s25 }
  0x4f   : > { %p36_p1 = scmp.eq.s32.totalorder %s35_s15, 0  ;;  %p46_p2 = scmp.eq.s32.totalorder %s1288_s27, 0 }
  0x50   : > { %p1702_p4 = scmp.eq.s32.totalorder %s1361_s28, 2  ;;  %p997_p8 = scmp.lt.s32.totalorder %s1288_s27, 3 }
  0x51   : > { %s1464_s17 = scalar_select %p36_p1, %s1284_s26, %s38_s13  }
  0x52   : > { %p1458_p6 = por %p1702_p4, %p45_p12  ;;  %p47_p11 = por %p46_p2, %p45_p12 }
  0x53   : > { %1704 = sst [smem:[#allocation19_spill]] %s1464_s17  ;;  %s269_s18 = sand.u32 1, %s1284_s26  }
  0x54   : > { %s853_s19 = sshll.u32 %s269_s18, 3  ;;  %s894_s14 = sshll.u32 %s1288_s27, 7 }
  0x55   : > { %s1705_s0 = sld [smem:[#allocation20_spill]]  ;;  %s273_s22 = scalar_lea.vmem [#allocation2], %s853_s19 }
  0x56   : > { %s280_s10 = sshll.u32 %s273_s22, 4  ;;  %p1475_p10 = pnand %p997_p8, %p47_p11  ;;  %s1473_s10 = int_to_ptr.vmem [resolvable:$true] %s280_s10 }
  0x57   : > { %s1482_s20 = scalar_lea.hbm %s1679_s1, %s894_s14  ;;  %s294_s21 = scalar_lea.vmem [#allocation5], %s853_s19 }
  0x58   : > { %s1484_s29 = sshll.u32 %s294_s21, 4  ;;  %s1486_s2 = scalar_lea.sflag [#allocation3], %s269_s18  ;;  %s1518_s29 = int_to_ptr.vmem [resolvable:$true] %s1484_s29 }
  0x59   : > { %p1120_p0 = pneg %p1475_p10 }
  0x5b   : > { %s1471_s11 = scalar_lea.hbm %s1705_s0, %s894_s14  ;;  %s1123_s23 = scalar_lea.hbm %s1705_s0, 384 }
  0x5c   : > { %s1118_s22 = scalar_lea.hbm %s1471_s11, 128  ;;  %p1124_p7 = scmp.lt.u32.totalorder %s1471_s11, %s1705_s0 }
  0x5d   : > { %p1119_p13 = scmp.ne.s32.totalorder %s1471_s11, %s1118_s22  ;;  %p1125_p9 = scmp.lt.u32.totalorder %s1123_s23, %s1118_s22 }
  0x5e   : > { %p1127_p1 = scmp.lt.u32.totalorder %s1118_s22, %s1471_s11 }
  0x5f   : > { %p1121_p3 = pnand %p1120_p0, %p1119_p13  ;;  %p1126_p12 = por %p1125_p9, %p1124_p7 }
  0x61   : > { %p1122_p5 = pneg %p1121_p3  ;;  %p1128_p2 = por %p1127_p1, %p1126_p12 }
  0x63   : > { %p1129_p4 = pnand %p1128_p2, %p1122_p5 }
  0x65   : > { %1132 = shalt.err (!%p1129_p4)
}
  0x66   : > { %s1133_s18 = scalar_lea.vmem %s1473_s10, 128  ;;  %s1294_s4 = smov [#allocation2]  }
  0x67   : > { %p1134_p8 = scmp.ne.s32.totalorder %s1473_s10, %s1133_s18  ;;  %s1138_s17 = sshll.u32 %s1294_s4, 4  ;;  %s1139_s17 = int_to_ptr.vmem [resolvable:$false] %s1138_s17 }
  0x68   : > { %s1140_s19 = scalar_lea.vmem %s1139_s17, 256  ;;  %p1141_p3 = scmp.lt.s32.totalorder %s1473_s10, %s1139_s17 }
  0x69   : > { %p1136_p11 = pnand %p1134_p8, %p1120_p0  ;;  %p1142_p7 = scmp.lt.s32.totalorder %s1140_s19, %s1133_s18 }
  0x6b   : > { %p1137_p13 = pneg %p1136_p11  ;;  %p1143_p9 = por %p1142_p7, %p1141_p3 }
  0x6d   : > { %p1144_p12 = pnand %p1143_p9, %p1137_p13 }
  0x6f   : > { %1147 = shalt.err (!%p1144_p12)
}
  0x70   : > { %s1707_s21 = smov 4   ;;  %s1708_s22 = smov 64  }
  0x71   : > { %984 = dma.hbm_to_vmem [thread:$0]  (!%p1475_p10), %s1471_s11, 128, %s1473_s10, %s1486_s2, %s1708_s22, %s1708_s22, %s1707_s21  }
  0x72   : > { %s290_s23 = sand.u32 1, %s1288_s27   ;;  %s1148_s14 = scalar_lea.hbm %s1482_s20, 128 }
  0x73   : > { %s1521_s15 = scalar_lea.sflag [#allocation6], %s290_s23  ;;  %p1149_p5 = scmp.ne.s32.totalorder %s1482_s20, %s1148_s14 }
  0x74   : > { %s1153_s17 = scalar_lea.hbm %s1679_s1, 384  ;;  %p1154_p4 = scmp.lt.u32.totalorder %s1482_s20, %s1679_s1 }
  0x75   : > { %p1151_p1 = pnand %p1149_p5, %p1120_p0  ;;  %p1155_p8 = scmp.lt.u32.totalorder %s1153_s17, %s1148_s14 }
  0x76   : > { %p1157_p13 = scmp.lt.u32.totalorder %s1148_s14, %s1482_s20 }
  0x77   : > { %p1152_p2 = pneg %p1151_p1  ;;  %p1156_p11 = por %p1155_p8, %p1154_p4 }
  0x79   : > { %p1158_p3 = por %p1157_p13, %p1156_p11 }
  0x7b   : > { %p1159_p7 = pnand %p1158_p3, %p1152_p2 }
  0x7d   : > { %1162 = shalt.err (!%p1159_p7)
}
  0x7e   : > { %s1163_s2 = scalar_lea.vmem %s1518_s29, 128  ;;  %s1295_s11 = smov [#allocation5]  }
  0x7f   : > { %p1164_p9 = scmp.ne.s32.totalorder %s1518_s29, %s1163_s2  ;;  %s1168_s10 = sshll.u32 %s1295_s11, 4  ;;  %s1169_s10 = int_to_ptr.vmem [resolvable:$false] %s1168_s10 }
  0x80   : > { %s1170_s0 = scalar_lea.vmem %s1169_s10, 256  ;;  %p1171_p1 = scmp.lt.s32.totalorder %s1518_s29, %s1169_s10 }
  0x81   : > { %p1166_p12 = pnand %p1164_p9, %p1120_p0  ;;  %p1172_p4 = scmp.lt.s32.totalorder %s1170_s0, %s1163_s2 }
  0x83   : > { %p1167_p5 = pneg %p1166_p12  ;;  %p1173_p8 = por %p1172_p4, %p1171_p1 }
  0x85   : > { %p1174_p11 = pnand %p1173_p8, %p1167_p5 }
  0x87   : > { %1177 = shalt.err (!%p1174_p11)
}
  0x88   : > { %987 = dma.hbm_to_vmem [thread:$0]  (!%p1475_p10), %s1482_s20, 128, %s1518_s29, %s1521_s15, %s1708_s22, %s1708_s22, %s1707_s21  }
  0x89   : > { %p1709_p0 = scmp.ne.s32.totalorder %s1698_s9, 0 }
  0x8a   : > { %s1553_s23 = sand.u32 (!%p1709_p0), 1, %s1280_s25   ;;  %p1710_p2 = scmp.ne.s32.totalorder (!%p1709_p0), %s1696_s30, 0 }
  0x8b   : > { %313 = sbr.rel (%p1709_p0) target bundleno = 801 (0x321), region = 44  ;;  %s860_s14 = sshll.u32 (!%p1709_p0), %s1553_s23, 3 }
  0x8c   : > { %s316_s18 = scalar_lea.sflag (!%p1709_p0), [#allocation3], %s1553_s23  ;;  %s319_s4 = scalar_lea.vmem (!%p1709_p0), [#allocation2], %s860_s14 }
  0x92   : > { %1251 = dma.done.wait (%p1710_p2), %s316_s18, 128  }
  0x93   : > { %1253 = vsyncadd (%p1710_p2), %s316_s18, 4294967168  ;;  %s324_s29 = sand.u32 1, %s1361_s28   ;;  %s1562_s9 = scalar_lea.vmem [#allocation5], %s860_s14 }
  0x94   : > { %s325_s13 = scalar_lea.sflag [#allocation6], %s324_s29 }
  0x95   : > { %1255 = dma.done.wait (%p1710_p2), %s325_s13, 128  }
  0x96   : > { %1257 = vsyncadd (%p1710_p2), %s325_s13, 4294967168  ;;  %p1711_p10 = scmp.eq.s32.totalorder %s1361_s28, 0 }
  0x98   : > { %1259 = dma.done.wait (%p1711_p10), [#allocation6], 1024   ;;  %p1712_p13 = pmov %p1711_p10 }
  0x99   : > { %p1713_p3 = pmov %p1711_p10 }
  0x9a   : > { %1261 = vsyncadd (%p1712_p13), [#allocation6], 4294966272 }
  0x9b   : > { %1263 = dma.done.wait (%p1713_p3), [#allocation9], 1024   ;;  %p1714_p7 = pmov %p1713_p3 }
  0x9c   : > { %v1039_v0 = vld [vmem:[#allocation7] sm:$0xff]   ;;  %v1040_v1 = vld [vmem:[#allocation7 + $0x8] sm:$0xff]   ;;  %v1041_v2 = vld [vmem:[#allocation7 + $0x10] sm:$0xff]   ;;  %s864_s21 = sshll.u32 %s1553_s23, 4  ;;  %s896_s2 = sshll.u32 %s1361_s28, 8 }
  0x9d   : > { %1265 = vsyncadd (%p1714_p7), [#allocation9], 4294966272  ;;  %918 = vmatprep.subr.bf16.mxu0 %v1039_v0  ;;  %v1042_v3 = vld [vmem:[#allocation7 + $0x18] sm:$0xff]   ;;  %v1047_v4 = vld [vmem:[%s319_s4] sm:$0xff]   ;;  %s369_s17 = scalar_lea.vmem [#allocation10], %s864_s21  ;;  %s1594_s0 = scalar_lea.hbm %s1684_s6, %s896_s2 }
  0x9e   : > { %919 = vmatpush3.bf16.msra.mxu0 %v1039_v0  ;;  %v1043_v5 = vld [vmem:[#allocation7 + $0x20] sm:$0xff]   ;;  %934 = vmatprep.mubr.bf16.mxu0 %v1047_v4  ;;  %v1050_v7 = vld [vmem:[#allocation8 + $0x8] sm:$0xff]   ;;  %v1045_v9 = vld [vmem:[#allocation7 + $0x30] sm:$0xff]   ;;  %s685_s19 = sshll.u32 %s369_s17, 4  ;;  %s667_s14 = scalar_lea.sflag [#allocation4], %s1553_s23  ;;  %s1586_s19 = int_to_ptr.vmem [resolvable:$true] %s685_s19 }
  0x9f   : > { %920 = vmatprep.subr.bf16.mxu0 %v1040_v1  ;;  %v1049_v6 = vld [vmem:[#allocation8] sm:$0xff]   ;;  %v1044_v8 = vld [vmem:[#allocation7 + $0x28] sm:$0xff]   ;;  %v1046_v10 = vld [vmem:[#allocation7 + $0x38] sm:$0xff]   ;;  %s1178_s18 = scalar_lea.vmem %s1586_s19, 256  ;;  %s1296_s4 = smov [#allocation10]  }
  0xa0   : > { %938 = vmatprep.subr.bf16.mxu1 %v1049_v6  ;;  %v384_v11 = vld [vmem:[%s1562_s9] sm:$0xff]   ;;  %v1053_v14 = vld [vmem:[#allocation8 + $0x20] sm:$0xff]   ;;  %v1054_v15 = vld [vmem:[#allocation8 + $0x28] sm:$0xff]   ;;  %p1179_p9 = scmp.ne.s32.totalorder %s1586_s19, %s1178_s18  ;;  %s1182_s29 = sshll.u32 %s1296_s4, 4  ;;  %s1183_s29 = int_to_ptr.vmem [resolvable:$false] %s1182_s29 }
  0xa1   : > { %939 = vmatpush3.bf16.msra.mxu1 %v1049_v6  ;;  %v1051_v12 = vld [vmem:[#allocation8 + $0x10] sm:$0xff]   ;;  %v1052_v13 = vld [vmem:[#allocation8 + $0x18] sm:$0xff]   ;;  %v876_v18 = vld [vmem:[%s1681_s3] ss:$0 sm:$0xff]  ;;  %v654_v35 = vunpack.c.l.bf16 %v384_v11  ;;  %v655_v39 = vunpack.c.h.bf16 %v384_v11  ;;  %s1184_s13 = scalar_lea.vmem %s1183_s29, 512  ;;  %p1185_p1 = scmp.lt.s32.totalorder %s1586_s19, %s1183_s29 }
  0xa2   : > { %921 = vmatpush3.bf16.msra.mxu0 %v1040_v1  ;;  %940 = vmatprep.subr.bf16.mxu1 %v1050_v7  ;;  %v1055_v16 = vld [vmem:[#allocation8 + $0x30] sm:$0xff]   ;;  %v1056_v17 = vld [vmem:[#allocation8 + $0x38] sm:$0xff]   ;;  %v885_v36 = vld [vmem:[%s1683_s5] ss:$0 sm:$0xff]  ;;  %p1180_p12 = pnand %p1179_p9, %p1458_p6  ;;  %p1186_p4 = scmp.lt.s32.totalorder %s1184_s13, %s1178_s18 }
  0xa3   : > { %922 = vmatprep.subr.bf16.mxu0 %v1041_v2 }
  0xa4   : > { %p1181_p5 = pneg %p1180_p12  ;;  %p1187_p8 = por %p1186_p4, %p1185_p1 }
  0xa5   : > { %941 = vmatpush3.bf16.msra.mxu1 %v1050_v7 }
  0xa6   : > { %923 = vmatpush3.bf16.msra.mxu0 %v1041_v2  ;;  %942 = vmatprep.subr.bf16.mxu1 %v1051_v12  ;;  %p1188_p11 = pnand %p1187_p8, %p1181_p5 }
  0xa7   : > { %924 = vmatprep.subr.bf16.mxu0 %v1042_v3 }
  0xa9   : > { %943 = vmatpush3.bf16.msra.mxu1 %v1051_v12 }
  0xaa   : > { %925 = vmatpush3.bf16.msra.mxu0 %v1042_v3  ;;  %944 = vmatprep.subr.bf16.mxu1 %v1052_v13 }
  0xab   : > { %926 = vmatprep.subr.bf16.mxu0 %v1043_v5 }
  0xad   : > { %945 = vmatpush3.bf16.msra.mxu1 %v1052_v13 }
  0xae   : > { %927 = vmatpush3.bf16.msra.mxu0 %v1043_v5  ;;  %946 = vmatprep.subr.bf16.mxu1 %v1053_v14 }
  0xaf   : > { %928 = vmatprep.subr.bf16.mxu0 %v1044_v8 }
  0xb1   : > { %947 = vmatpush3.bf16.msra.mxu1 %v1053_v14 }
  0xb2   : > { %929 = vmatpush3.bf16.msra.mxu0 %v1044_v8  ;;  %948 = vmatprep.subr.bf16.mxu1 %v1054_v15 }
  0xb3   : > { %930 = vmatprep.subr.bf16.mxu0 %v1045_v9 }
  0xb5   : > { %949 = vmatpush3.bf16.msra.mxu1 %v1054_v15 }
  0xb6   : > { %931 = vmatpush3.bf16.msra.mxu0 %v1045_v9  ;;  %950 = vmatprep.subr.bf16.mxu1 %v1055_v16 }
  0xb7   : > { %932 = vmatprep.subr.bf16.mxu0 %v1046_v10 }
  0xb9   : > { %951 = vmatpush3.bf16.msra.mxu1 %v1055_v16 }
  0xba   : > { %933 = vmatpush3.bf16.msra.mxu0 %v1046_v10  ;;  %952 = vmatprep.subr.bf16.mxu1 %v1056_v17 }
  0xbd   : > { %935 = vmatmul.mubr.bf16.vlgmr.msra.gmra.mrb[0].mxu0 %v384_v11  ;;  %953 = vmatpush3.bf16.msra.mxu1 %v1056_v17 }
 0x190   : > { %v936_v19 = vpop.f32.mrb[0].mxu0 }
 0x191   : > { %v514_v20 = vpop.f32.mrb[1].mxu0 }
 0x192   : > { %v535_v21 = vadd.f32 %v876_v18, %v514_v20  ;;  %v937_v22 = vpop.f32.mrb[2].mxu0 }
 0x193   : > { %v517_v23 = vpop.f32.mrb[3].mxu0 }
 0x194   : > { %1058 = vtanh.f32 %v535_v21  ;;  %v536_v24 = vadd.f32 %v876_v18, %v517_v23 }
 0x196   : > { %1060 = vtanh.f32 %v536_v24 }
 0x19e   : > { %v1059_v25 = vpop.eup %1058 }
 0x19f   : > { %v539_v26 = vmul.f32 %v1059_v25, %v1059_v25 }
 0x1a0   : > { %v1061_v27 = vpop.eup %1060 }
 0x1a1   : > { %v545_v28 = vpack.c.bf16 %v1061_v27, %v1059_v25  ;;  %v540_v29 = vmul.f32 %v1061_v27, %v1061_v27  ;;  %v541_v30 = vsub.f32 1.0, %v539_v26 }
 0x1a3   : > { %954 = vmatprep.mubr.bf16.mxu1 %v545_v28  ;;  %v542_v31 = vsub.f32 1.0, %v540_v29  ;;  %v543_v32 = vmul.f32 %v936_v19, %v541_v30 }
 0x1a5   : > { %v544_v33 = vmul.f32 %v937_v22, %v542_v31 }
 0x1a7   : > { %v546_v34 = vpack.c.bf16 %v544_v33, %v543_v32 }
 0x1a9   : > { %955 = vmatmul.mubr.bf16.vlgmr.msra.gmra.mrb[0].mxu1 %v546_v34 }
 0x27c   : > { %v956_v37 = vpop.f32.mrb[0].mxu1 }
 0x27d   : > { %v629_v38 = vpop.f32.mrb[1].mxu1  ;;  %v656_v40 = vmul.f32 %v956_v37, %v654_v35 }
 0x27e   : > { %v650_v41 = vadd.f32 %v885_v36, %v629_v38  ;;  %v957_v42 = vpop.f32.mrb[2].mxu1 }
 0x27f   : > { %658 = vadd.xlane.f32.xlu0 %v656_v40  ;;  %v632_v43 = vpop.f32.mrb[3].mxu1  ;;  %v657_v45 = vmul.f32 %v957_v42, %v655_v39 }
 0x280   : > { %652 = vst [vmem:[%s369_s17] sm:$0xff] %v650_v41  ;;  %v651_v44 = vadd.f32 %v885_v36, %v632_v43 }
 0x282   : > { %653 = vst [vmem:[%s369_s17 + $0x8] sm:$0xff] %v651_v44 }
 0x283   : > { %660 = vadd.xlane.f32.xlu0 %v657_v45 }
 0x284   : > { %1191 = shalt.err (!%p1188_p11)
}
 0x285   : > { %s1192_s9 = scalar_lea.hbm %s1594_s0, 256  ;;  %s1196_s22 = scalar_lea.hbm %s1684_s6, 768 }
 0x286   : > { %p1193_p0 = scmp.ne.s32.totalorder %s1594_s0, %s1192_s9  ;;  %p1197_p13 = scmp.lt.u32.totalorder %s1594_s0, %s1684_s6 }
 0x287   : > { %p1198_p3 = scmp.lt.u32.totalorder %s1196_s22, %s1192_s9  ;;  %p1200_p9 = scmp.lt.u32.totalorder %s1192_s9, %s1594_s0 }
 0x288   : > { %p1194_p2 = pnand %p1193_p0, %p1458_p6 }
 0x289   : > { %p1199_p7 = por %p1198_p3, %p1197_p13 }
 0x28a   : > { %p1195_p10 = pneg %p1194_p2 }
 0x28b   : > { %p1201_p12 = por %p1200_p9, %p1199_p7 }
 0x28d   : > { %p1202_p5 = pnand %p1201_p12, %p1195_p10 }
 0x28f   : > { %1205 = shalt.err (!%p1202_p5)
}
 0x290   : > { %s1297_s11 = smov 128   ;;  %s1298_s10 = smov 8  }
 0x291   : > { %970 = dma.vmem_to_hbm [thread:$0]  (%p1458_p6), %s1586_s19, 256, %s1594_s0, %s667_s14, %s1297_s11, %s1297_s11, %s1298_s10  }
 0x292   : > { %s376_s18 = scalar_lea.vmem [#allocation11], %s864_s21  ;;  %s1632_s9 = scalar_lea.hbm %s1685_s7, %s896_s2 }
 0x293   : > { %s701_s4 = sshll.u32 %s376_s18, 4  ;;  %s672_s19 = scalar_lea.sflag [#allocation12], %s1553_s23  ;;  %s1625_s4 = int_to_ptr.vmem [resolvable:$true] %s701_s4 }
 0x294   : > { %s1206_s0 = scalar_lea.vmem %s1625_s4, 256  ;;  %s1299_s21 = smov [#allocation11]  }
 0x295   : > { %p1207_p1 = scmp.ne.s32.totalorder %s1625_s4, %s1206_s0  ;;  %s1210_s14 = sshll.u32 %s1299_s21, 4  ;;  %s1211_s14 = int_to_ptr.vmem [resolvable:$false] %s1210_s14 }
 0x296   : > { %s1212_s30 = scalar_lea.vmem %s1211_s14, 512  ;;  %p1213_p11 = scmp.lt.s32.totalorder %s1625_s4, %s1211_s14 }
 0x297   : > { %p1208_p4 = pnand %p1207_p1, %p1458_p6  ;;  %p1214_p0 = scmp.lt.s32.totalorder %s1212_s30, %s1206_s0 }
 0x299   : > { %p1209_p8 = pneg %p1208_p4  ;;  %p1215_p2 = por %p1214_p0, %p1213_p11 }
 0x29b   : > { %p1216_p10 = pnand %p1215_p2, %p1209_p8 }
 0x30c   : > { %v659_v46 = vpop.xlane.xlu0 %658 }
 0x30d   : > { %v662_v47 = vsub.f32 0.0, %v659_v46 }
 0x30f   : > { %664 = vst [vmem:[%s376_s18] sm:$0xff] %v662_v47 }
 0x310   : > { %v661_v48 = vpop.xlane.xlu0 %660 }
 0x311   : > { %v663_v49 = vsub.f32 0.0, %v661_v48 }
 0x313   : > { %665 = vst [vmem:[%s376_s18 + $0x8] sm:$0xff] %v663_v49 }
 0x314   : > { %1219 = shalt.err (!%p1216_p10)
}
 0x315   : > { %s1220_s28 = scalar_lea.hbm %s1632_s9, 256  ;;  %s1224_s22 = scalar_lea.hbm %s1685_s7, 768 }
 0x316   : > { %p1221_p13 = scmp.ne.s32.totalorder %s1632_s9, %s1220_s28  ;;  %p1225_p9 = scmp.lt.u32.totalorder %s1632_s9, %s1685_s7 }
 0x317   : > { %p1226_p12 = scmp.lt.u32.totalorder %s1224_s22, %s1220_s28  ;;  %p1228_p1 = scmp.lt.u32.totalorder %s1220_s28, %s1632_s9 }
 0x318   : > { %p1222_p3 = pnand %p1221_p13, %p1458_p6 }
 0x319   : > { %p1227_p5 = por %p1226_p12, %p1225_p9 }
 0x31a   : > { %p1223_p7 = pneg %p1222_p3 }
 0x31b   : > { %p1229_p4 = por %p1228_p1, %p1227_p5 }
 0x31d   : > { %p1230_p8 = pnand %p1229_p4, %p1223_p7 }
 0x31f   : > { %1233 = shalt.err (!%p1230_p8)
}
 0x320   : > { %971 = dma.vmem_to_hbm [thread:$0]  (%p1458_p6), %s1625_s4, 256, %s1632_s9, %s672_s19, %s1297_s11, %s1297_s11, %s1298_s10  }
 0x321 PF: > { %p1000_p11 = scmp.ge.s32.totalorder %s1288_s27, 2  ;;  %s716_s18 = sand.u32 1, %s1276_s24  }
 0x322   : > { %p1715_p0 = scmp.ne.s32.totalorder %s1697_s8, 0  ;;  %s717_s29 = scalar_lea.sflag [#allocation4], %s716_s18 }
 0x324   : > { %p989_p2 = pnand %p1000_p11, %p1715_p0 }
 0x326   : > { %1267 = dma.done.wait (!%p989_p2), %s717_s29, 256  }
 0x327   : > { %1269 = vsyncadd (!%p989_p2), %s717_s29, 4294967040  ;;  %s726_s16 = scalar_lea.sflag [#allocation12], %s716_s18 }
 0x328   : > { %1271 = dma.done.wait (!%p989_p2), %s726_s16, 256  }
 0x329   : > { %1273 = vsyncadd (!%p989_p2), %s726_s16, 4294967040  ;;  %s1716_s23 = sld [smem:[#allocation19_spill]]  ;;  %p28_p6 = scmp.ge.s32.totalorder %s1448_s12, 5  }
 0x32a   : > { %s1717_s24 = smov %s1280_s25  ;;  %s1718_s25 = smov %s1284_s26 }
 0x32b   : > { %s1720_s27 = smov %s1448_s12  ;;  %30 = sbr.rel (!%p28_p6) target bundleno = 14 (0xe), region = 127 }
 0x32f   : > { %s1719_s26 = smov %s1716_s23 }
 0x332   :  { %731 = vsyncpa [#allocation3], 1 }
 0x333   :  { %733 = vsyncpa [#allocation3 + $0x1], 1 }
 0x334   :  { %734 = vsyncpa [#allocation6], 1 }
 0x335   :  { %736 = vsyncpa [#allocation6 + $0x1], 1 }
 0x336   :  { %737 = vsyncpa [#allocation9], 1 }
 0x337   :  { %738 = vsyncpa [#allocation4], 1 }
 0x338   :  { %740 = vsyncpa [#allocation4 + $0x1], 1 }
 0x339   :  { %741 = vsyncpa [#allocation12], 1 }
 0x33a   :  { %743 = vsyncpa [#allocation12 + $0x1], 1 }

</bundles_post_ra>
